<compile_context>
chip_gen: v7x
topology: tpu7x:2x2x1
jax: 0.10.0
libtpu: 0.0.40
codegen_flags: <defaults>
</compile_context>

<pallas_src>
import functools

import jax
import jax.numpy as jnp
from jax import lax
from jax.experimental import pallas as pl
from jax.experimental.pallas import tpu as pltpu


def _round_up(x, m):
    return (x + m - 1) // m * m


def _cdiv(a, b):
    return -(-a // b)


def _vmem_limit_bytes():
    """Generation-aware VMEM limit (v5e/v6e: 128 MiB, v7x: 64 MiB physical)."""
    cap = 128 * 1024 * 1024
    try:
        cap = int(getattr(pltpu.get_tpu_info(), "vmem_capacity_bytes", cap))
    except Exception:
        pass
    return int(min((cap * 3) // 4, 100 * 1024 * 1024))


def _conv_bn_act_kernel(x_ref, w_ref, shift_ref, o_ref, *, K, S, Wps, tm, wtot, act):
    """One grid step = `tm` flat output positions (lanes) of one image.

    x_ref:     (1, S*S, Cin, Hps*Wps)  space-to-depth, flat, padded input (compute dtype)
    w_ref:     (K*K, Coutp, Cin)       BN-scale-folded conv weights       (compute dtype)
    shift_ref: (Coutp, 1)              BN shift (f32)
    o_ref:     (1, Coutp, tm)          output tile (f32) — written exactly once
    """
    i = pl.program_id(1)
    base = pl.multiple_of(i * tm, 128)        # tm % 128 == 0 -> lane-aligned window start

    acc = None                                # vreg-resident f32 accumulator
    xw_cache = {}                             # one widened aligned load per s2d phase
    for kh in range(K):                       # static tap loop
        for kw in range(K):
            ph, khd = kh % S, kh // S
            pw, kwd = kw % S, kw // S
            sidx = ph * S + pw
            if sidx not in xw_cache:          # (Cin, wtot), aligned dynamic start
                xw_cache[sidx] = x_ref[0, sidx, :, pl.ds(base, wtot)]
            off = khd * Wps + kwd             # static tap offset -> static lane slice
            lhs = xw_cache[sidx][:, off:off + tm]                       # (Cin, tm)
            d = jnp.dot(w_ref[kh * K + kw], lhs,
                        preferred_element_type=jnp.float32)             # (Coutp, tm)
            acc = d if acc is None else acc + d

    y = acc + shift_ref[...]                  # f32 epilogue: BN shift (lane broadcast)
    if act is None or act == "identity":
        pass                                  # nn.Identity
    elif act == "relu":
        y = jnp.maximum(y, 0.0)
    elif act in ("silu", "swish"):
        y = y * jax.nn.sigmoid(y)
    elif act == "gelu":
        # TODO(synk): PyTorch nn.GELU defaults to exact erf; tanh approx would be faster.
        y = jax.nn.gelu(y, approximate=False)
    elif act == "leaky_relu":
        y = jnp.where(y >= 0.0, y, 0.01 * y)
    elif act == "hardsigmoid":
        y = jnp.clip(y / 6.0 + 0.5, 0.0, 1.0)
    else:
        raise NotImplementedError(f"activation {act!r}")
    o_ref[0, :, :] = y.astype(o_ref.dtype)    # single store per grid step


def conv_norm_layer(x_nchw, weight, gamma, beta, running_mean, running_var, *,
                    stride, padding=None, act=None, eps=1e-5, conv_bias=None,
                    compute_dtype=jnp.bfloat16):
    """Forward of ConvNormLayer. BatchNorm uses running stats (eval semantics)."""
    N, Cin, H, W = x_nchw.shape
    Cout, Cin_w, K, K2 = weight.shape
    assert Cin_w == Cin and K2 == K, "grouped conv not supported here"
    pad = (K - 1) // 2 if padding is None else int(padding)
    S = int(stride)

    Ho = (H + 2 * pad - K) // S + 1
    Wo = (W + 2 * pad - K) // S + 1
    kd_max = (K - 1) // S                     # max khd == max kwd after space-to-depth

    # ---- fold BatchNorm(eval) into a weight scale + output shift --------------
    scale = (gamma / jnp.sqrt(running_var + eps)).astype(jnp.float32)           # (Cout,)
    bias = (jnp.zeros((Cout,), jnp.float32) if conv_bias is None
            else conv_bias.astype(jnp.float32))
    shift = (beta + (bias - running_mean) * scale).astype(jnp.float32)           # (Cout,)

    Coutp = _round_up(Cout, 8)                # channel-on-sublane output: pad to 8, not 128
    w_f = weight.astype(jnp.float32) * scale[:, None, None, None]                # (Cout,Cin,K,K)
    w_f = jnp.transpose(w_f, (2, 3, 0, 1)).reshape(K * K, Cout, Cin)
    w_f = jnp.pad(w_f, ((0, 0), (0, Coutp - Cout), (0, 0))).astype(compute_dtype)
    shift_p = jnp.pad(shift, (0, Coutp - Cout)).reshape(Coutp, 1)

    # ---- flat-spatial geometry -------------------------------------------------
    # Output flat position p = row*Wps + col; tap (kh,kw) reads flat index
    # p + khd*Wps + kwd of the space-to-depth input.  Columns >= Wo / rows >= Ho are
    # garbage and sliced away after the kernel.
    Wps = max(Wo + kd_max, _cdiv(W + 2 * pad, S))
    Ptot = Ho * Wps                                        # flat positions that matter

    # Tile size: lane-dense (multiple of 128), sized so acc + widened input stay in vregs.
    itemsize = jnp.dtype(compute_dtype).itemsize
    pack = 8 * (4 // itemsize)                             # sublane packing (8 f32 / 16 bf16)
    per_lane = 4 * Coutp + itemsize * _round_up(Cin, pack) * S * S
    tm = max(128, (96 * 1024 // per_lane) // 128 * 128)
    tm = min(tm, _round_up(Ptot, 128))
    n_tiles = _cdiv(Ptot, tm)
    if N == 1 and n_tiles == 1 and Ptot > 128:
        tm = _round_up(_cdiv(Ptot, 2), 128)                # give megacore >= 2 steps
        n_tiles = _cdiv(Ptot, tm)
    Ppad = n_tiles * tm

    halo = _round_up(kd_max * Wps + kd_max, 128) if kd_max > 0 else 0
    wtot = tm + halo                                       # widened aligned load length
    Lin = Ppad + halo                                      # flat input length we may read
    Hps = max(_cdiv(Lin, Wps), _cdiv(H + 2 * pad, S))
    # Tap-wrap safety (review correctness note): real outputs never wrap rows.
    assert Wps >= Wo + kd_max and Hps >= Ho + kd_max and Hps * Wps >= Lin

    # ---- single fused pad + space-to-depth (no NCHW<->NHWC transposes) --------
    x = x_nchw.astype(compute_dtype)
    xp = jnp.pad(x, ((0, 0), (0, 0),
                     (pad, S * Hps - H - pad),
                     (pad, S * Wps - W - pad)))
    # xs[n, ph*S+pw, c, a*Wps + b] == xp[n, c, a*S+ph, b*S+pw]
    xs = xp.reshape(N, Cin, Hps, S, Wps, S).transpose(0, 3, 5, 1, 2, 4)
    xs = xs.reshape(N, S * S, Cin, Hps * Wps)

    kernel = functools.partial(_conv_bn_act_kernel, K=K, S=S, Wps=Wps,
                               tm=tm, wtot=wtot, act=act)

    out = pl.pallas_call(
        kernel,
        out_shape=jax.ShapeDtypeStruct((N, Coutp, Ppad), jnp.float32),
        grid_spec=pltpu.PrefetchScalarGridSpec(
            num_scalar_prefetch=0,
            grid=(N, n_tiles),
            in_specs=[
                # Whole (space-to-depth) image per batch element; index map depends
                # only on n so it is re-DMAed only when the image changes.
                pl.BlockSpec((1, S * S, Cin, Hps * Wps), lambda n, i: (n, 0, 0, 0)),
                # Grid-invariant folded weights and BN shift (tiny; double-buffered
                # by default, which costs negligible VMEM at these sizes).
                pl.BlockSpec((K * K, Coutp, Cin), lambda n, i: (0, 0, 0)),
                pl.BlockSpec((Coutp, 1), lambda n, i: (0, 0)),
            ],
            out_specs=pl.BlockSpec((1, Coutp, tm), lambda n, i: (n, 0, i)),
        ),
        compiler_params=pltpu.CompilerParams(
            # Shard megacore over images when possible; splitting the inner axis
            # across cores would duplicate the whole-image input DMA.
            dimension_semantics=("parallel", "arbitrary" if N > 1 else "parallel"),
            vmem_limit_bytes=_vmem_limit_bytes()),
    )(xs, w_f, shift_p)

    # Already channel-major (NCHW); just drop channel/spatial padding.
    out = out[:, :Cout, :Ho * Wps].reshape(N, Cout, Ho, Wps)[:, :, :, :Wo]
    return out


def _reference(x_nchw, weight, gamma, beta, running_mean, running_var, *,
               stride, padding, act, eps=1e-5, compute_dtype=jnp.bfloat16):
    # Same math as the kernel (same bf16 quantization of x and of the BN-folded
    # weights, f32 accumulation) so the comparison tolerance can stay tight.
    scale = gamma / jnp.sqrt(running_var + eps)
    shift = beta - running_mean * scale
    w_q = (weight.astype(jnp.float32) * scale[:, None, None, None]
           ).astype(compute_dtype).astype(jnp.float32)
    x_q = x_nchw.astype(compute_dtype).astype(jnp.float32)
    y = lax.conv_general_dilated(
        x_q, w_q, window_strides=(stride, stride),
        padding=[(padding, padding), (padding, padding)],
        dimension_numbers=("NCHW", "OIHW", "NCHW"))
    y = y + shift[None, :, None, None]
    if act == "relu":
        y = jnp.maximum(y, 0.0)
    return y


if __name__ == "__main__":
    # Module config: ConvNormLayer(ch_in=4, ch_out=8, kernel_size=3, stride=1, act='relu')
    N, Cin, H, W = 2, 4, 16, 16
    Cout, K, S = 8, 3, 1
    pad = (K - 1) // 2
    act = "relu"

    key = jax.random.PRNGKey(0)
    kx, kw, kg, kb, km, kv = jax.random.split(key, 6)
    x = jax.random.normal(kx, (N, Cin, H, W), jnp.float32)
    weight = jax.random.normal(kw, (Cout, Cin, K, K), jnp.float32) * 0.1
    gamma = jax.random.uniform(kg, (Cout,), jnp.float32, 0.5, 1.5)
    beta = jax.random.normal(kb, (Cout,), jnp.float32) * 0.1
    running_mean = jax.random.normal(km, (Cout,), jnp.float32) * 0.1
    running_var = jax.random.uniform(kv, (Cout,), jnp.float32, 0.5, 1.5)

    out = conv_norm_layer(x, weight, gamma, beta, running_mean, running_var,
                          stride=S, padding=pad, act=act)
    out = jax.block_until_ready(out)

    ref = _reference(x, weight, gamma, beta, running_mean, running_var,
                     stride=S, padding=pad, act=act)
    Ho = (H + 2 * pad - K) // S + 1
    Wo = (W + 2 * pad - K) // S + 1
    assert out.shape == (N, Cout, Ho, Wo)
    assert jnp.allclose(out, ref, atol=2e-3, rtol=2e-3), \
        float(jnp.max(jnp.abs(out - ref)))
    print("KERNEL_OK")
</pallas_src>

<mosaic_0001>
module attributes {stable_mosaic.version = 11 : i64} {
  func.func @_conv_bn_act_kernel(%arg0: i32, %arg1: i32, %arg2: memref<1x1x4x522xbf16, #tpu.memory_space<vmem>>, %arg3: memref<9x8x4xbf16, #tpu.memory_space<vmem>>, %arg4: memref<8x1xf32, #tpu.memory_space<vmem>>, %arg5: memref<1x8x384xf32, #tpu.memory_space<vmem>>) attributes {dimension_semantics = [#tpu.dimension_semantics<parallel>, #tpu.dimension_semantics<arbitrary>], iteration_bounds = array<i64: 2, 1>, scalar_prefetch = 0 : i64, scratch_operands = 0 : i64, tpu.core_type = #tpu.core_type<tc>, window_params = [{transform_indices = @transform_0, window_bounds = array<i64: 1, 1, 4, 522>}, {pipeline_mode = #tpu.pipeline_mode<synchronous>, transform_indices = @transform_1, window_bounds = array<i64: 9, 8, 4>}, {pipeline_mode = #tpu.pipeline_mode<synchronous>, transform_indices = @transform_2, window_bounds = array<i64: 8, 1>}, {transform_indices = @transform_3, window_bounds = array<i64: 1, 8, 384>}]} {
    %c384_i32 = arith.constant 384 : i32
    %0 = arith.muli %arg1, %c384_i32 : i32
    %1 = tpu.assume_multiple %0, 128 : i32
    %c0 = arith.constant 0 : index
    %c0_0 = arith.constant 0 : index
    %c0_1 = arith.constant 0 : index
    %2 = arith.index_cast %1 : i32 to index
    %3 = vector.load %arg2[%c0, %c0_0, %c0_1, %2] : memref<1x1x4x522xbf16, #tpu.memory_space<vmem>>, vector<1x1x4x512xbf16>
    %4 = vector.shape_cast %3 : vector<1x1x4x512xbf16> to vector<4x512xbf16>
    %5 = vector.extract_strided_slice %4 {offsets = [0, 0], sizes = [4, 384], strides = [1, 1]} : vector<4x512xbf16> to vector<4x384xbf16>
    %c0_2 = arith.constant 0 : index
    %c0_3 = arith.constant 0 : index
    %c0_4 = arith.constant 0 : index
    %6 = vector.load %arg3[%c0_2, %c0_3, %c0_4] : memref<9x8x4xbf16, #tpu.memory_space<vmem>>, vector<1x8x4xbf16>
    %7 = vector.shape_cast %6 : vector<1x8x4xbf16> to vector<8x4xbf16>
    %cst = arith.constant dense<0.000000e+00> : vector<8x384xf32>
    %8 = tpu.matmul %7, %5, %cst {dimension_numbers = #tpu.dot_dimension_numbers<[1], [0], [0], [1], [0, 0, 1, 1], [], []>} : vector<8x4xbf16>, vector<4x384xbf16>, vector<8x384xf32> -> vector<8x384xf32>
    %9 = vector.extract_strided_slice %4 {offsets = [0, 1], sizes = [4, 384], strides = [1, 1]} : vector<4x512xbf16> to vector<4x384xbf16>
    %c1 = arith.constant 1 : index
    %c0_5 = arith.constant 0 : index
    %c0_6 = arith.constant 0 : index
    %10 = vector.load %arg3[%c1, %c0_5, %c0_6] : memref<9x8x4xbf16, #tpu.memory_space<vmem>>, vector<1x8x4xbf16>
    %11 = vector.shape_cast %10 : vector<1x8x4xbf16> to vector<8x4xbf16>
    %cst_7 = arith.constant dense<0.000000e+00> : vector<8x384xf32>
    %12 = tpu.matmul %11, %9, %cst_7 {dimension_numbers = #tpu.dot_dimension_numbers<[1], [0], [0], [1], [0, 0, 1, 1], [], []>} : vector<8x4xbf16>, vector<4x384xbf16>, vector<8x384xf32> -> vector<8x384xf32>
    %13 = arith.addf %8, %12 : vector<8x384xf32>
    %14 = vector.extract_strided_slice %4 {offsets = [0, 2], sizes = [4, 384], strides = [1, 1]} : vector<4x512xbf16> to vector<4x384xbf16>
    %c2 = arith.constant 2 : index
    %c0_8 = arith.constant 0 : index
    %c0_9 = arith.constant 0 : index
    %15 = vector.load %arg3[%c2, %c0_8, %c0_9] : memref<9x8x4xbf16, #tpu.memory_space<vmem>>, vector<1x8x4xbf16>
    %16 = vector.shape_cast %15 : vector<1x8x4xbf16> to vector<8x4xbf16>
    %cst_10 = arith.constant dense<0.000000e+00> : vector<8x384xf32>
    %17 = tpu.matmul %16, %14, %cst_10 {dimension_numbers = #tpu.dot_dimension_numbers<[1], [0], [0], [1], [0, 0, 1, 1], [], []>} : vector<8x4xbf16>, vector<4x384xbf16>, vector<8x384xf32> -> vector<8x384xf32>
    %18 = arith.addf %13, %17 : vector<8x384xf32>
    %19 = vector.extract_strided_slice %4 {offsets = [0, 18], sizes = [4, 384], strides = [1, 1]} : vector<4x512xbf16> to vector<4x384xbf16>
    %c3 = arith.constant 3 : index
    %c0_11 = arith.constant 0 : index
    %c0_12 = arith.constant 0 : index
    %20 = vector.load %arg3[%c3, %c0_11, %c0_12] : memref<9x8x4xbf16, #tpu.memory_space<vmem>>, vector<1x8x4xbf16>
    %21 = vector.shape_cast %20 : vector<1x8x4xbf16> to vector<8x4xbf16>
    %cst_13 = arith.constant dense<0.000000e+00> : vector<8x384xf32>
    %22 = tpu.matmul %21, %19, %cst_13 {dimension_numbers = #tpu.dot_dimension_numbers<[1], [0], [0], [1], [0, 0, 1, 1], [], []>} : vector<8x4xbf16>, vector<4x384xbf16>, vector<8x384xf32> -> vector<8x384xf32>
    %23 = arith.addf %18, %22 : vector<8x384xf32>
    %24 = vector.extract_strided_slice %4 {offsets = [0, 19], sizes = [4, 384], strides = [1, 1]} : vector<4x512xbf16> to vector<4x384xbf16>
    %c4 = arith.constant 4 : index
    %c0_14 = arith.constant 0 : index
    %c0_15 = arith.constant 0 : index
    %25 = vector.load %arg3[%c4, %c0_14, %c0_15] : memref<9x8x4xbf16, #tpu.memory_space<vmem>>, vector<1x8x4xbf16>
    %26 = vector.shape_cast %25 : vector<1x8x4xbf16> to vector<8x4xbf16>
    %cst_16 = arith.constant dense<0.000000e+00> : vector<8x384xf32>
    %27 = tpu.matmul %26, %24, %cst_16 {dimension_numbers = #tpu.dot_dimension_numbers<[1], [0], [0], [1], [0, 0, 1, 1], [], []>} : vector<8x4xbf16>, vector<4x384xbf16>, vector<8x384xf32> -> vector<8x384xf32>
    %28 = arith.addf %23, %27 : vector<8x384xf32>
    %29 = vector.extract_strided_slice %4 {offsets = [0, 20], sizes = [4, 384], strides = [1, 1]} : vector<4x512xbf16> to vector<4x384xbf16>
    %c5 = arith.constant 5 : index
    %c0_17 = arith.constant 0 : index
    %c0_18 = arith.constant 0 : index
    %30 = vector.load %arg3[%c5, %c0_17, %c0_18] : memref<9x8x4xbf16, #tpu.memory_space<vmem>>, vector<1x8x4xbf16>
    %31 = vector.shape_cast %30 : vector<1x8x4xbf16> to vector<8x4xbf16>
    %cst_19 = arith.constant dense<0.000000e+00> : vector<8x384xf32>
    %32 = tpu.matmul %31, %29, %cst_19 {dimension_numbers = #tpu.dot_dimension_numbers<[1], [0], [0], [1], [0, 0, 1, 1], [], []>} : vector<8x4xbf16>, vector<4x384xbf16>, vector<8x384xf32> -> vector<8x384xf32>
    %33 = arith.addf %28, %32 : vector<8x384xf32>
    %34 = vector.extract_strided_slice %4 {offsets = [0, 36], sizes = [4, 384], strides = [1, 1]} : vector<4x512xbf16> to vector<4x384xbf16>
    %c6 = arith.constant 6 : index
    %c0_20 = arith.constant 0 : index
    %c0_21 = arith.constant 0 : index
    %35 = vector.load %arg3[%c6, %c0_20, %c0_21] : memref<9x8x4xbf16, #tpu.memory_space<vmem>>, vector<1x8x4xbf16>
    %36 = vector.shape_cast %35 : vector<1x8x4xbf16> to vector<8x4xbf16>
    %cst_22 = arith.constant dense<0.000000e+00> : vector<8x384xf32>
    %37 = tpu.matmul %36, %34, %cst_22 {dimension_numbers = #tpu.dot_dimension_numbers<[1], [0], [0], [1], [0, 0, 1, 1], [], []>} : vector<8x4xbf16>, vector<4x384xbf16>, vector<8x384xf32> -> vector<8x384xf32>
    %38 = arith.addf %33, %37 : vector<8x384xf32>
    %39 = vector.extract_strided_slice %4 {offsets = [0, 37], sizes = [4, 384], strides = [1, 1]} : vector<4x512xbf16> to vector<4x384xbf16>
    %c7 = arith.constant 7 : index
    %c0_23 = arith.constant 0 : index
    %c0_24 = arith.constant 0 : index
    %40 = vector.load %arg3[%c7, %c0_23, %c0_24] : memref<9x8x4xbf16, #tpu.memory_space<vmem>>, vector<1x8x4xbf16>
    %41 = vector.shape_cast %40 : vector<1x8x4xbf16> to vector<8x4xbf16>
    %cst_25 = arith.constant dense<0.000000e+00> : vector<8x384xf32>
    %42 = tpu.matmul %41, %39, %cst_25 {dimension_numbers = #tpu.dot_dimension_numbers<[1], [0], [0], [1], [0, 0, 1, 1], [], []>} : vector<8x4xbf16>, vector<4x384xbf16>, vector<8x384xf32> -> vector<8x384xf32>
    %43 = arith.addf %38, %42 : vector<8x384xf32>
    %44 = vector.extract_strided_slice %4 {offsets = [0, 38], sizes = [4, 384], strides = [1, 1]} : vector<4x512xbf16> to vector<4x384xbf16>
    %c8 = arith.constant 8 : index
    %c0_26 = arith.constant 0 : index
    %c0_27 = arith.constant 0 : index
    %45 = vector.load %arg3[%c8, %c0_26, %c0_27] : memref<9x8x4xbf16, #tpu.memory_space<vmem>>, vector<1x8x4xbf16>
    %46 = vector.shape_cast %45 : vector<1x8x4xbf16> to vector<8x4xbf16>
    %cst_28 = arith.constant dense<0.000000e+00> : vector<8x384xf32>
    %47 = tpu.matmul %46, %44, %cst_28 {dimension_numbers = #tpu.dot_dimension_numbers<[1], [0], [0], [1], [0, 0, 1, 1], [], []>} : vector<8x4xbf16>, vector<4x384xbf16>, vector<8x384xf32> -> vector<8x384xf32>
    %48 = arith.addf %43, %47 : vector<8x384xf32>
    %c0_29 = arith.constant 0 : index
    %c0_30 = arith.constant 0 : index
    %49 = vector.load %arg4[%c0_29, %c0_30] : memref<8x1xf32, #tpu.memory_space<vmem>>, vector<8x1xf32>
    %50 = vector.broadcast %49 : vector<8x1xf32> to vector<8x384xf32>
    %51 = arith.addf %48, %50 : vector<8x384xf32>
    %cst_31 = arith.constant 0.000000e+00 : f32
    %52 = vector.broadcast %cst_31 : f32 to vector<8x384xf32>
    %53 = arith.maximumf %51, %52 : vector<8x384xf32>
    %c0_32 = arith.constant 0 : index
    %c0_33 = arith.constant 0 : index
    %c0_34 = arith.constant 0 : index
    %54 = vector.load %arg5[%c0_32, %c0_33, %c0_34] : memref<1x8x384xf32, #tpu.memory_space<vmem>>, vector<1x8x384xf32>
    %55 = vector.shape_cast %54 : vector<1x8x384xf32> to vector<8x384xf32>
    %56 = vector.shape_cast %53 : vector<8x384xf32> to vector<1x8x384xf32>
    tpu.vector_store %arg5[%c0_32, %c0_33, %c0_34], %56 {strides = array<i32>} : memref<1x8x384xf32, #tpu.memory_space<vmem>>, vector<1x8x384xf32>,
    return
  }
  func.func @transform_0(%arg0: i32, %arg1: i32) -> (i32, i32, i32, i32) {
    %c0_i32 = arith.constant 0 : i32
    %c0_i32_0 = arith.constant 0 : i32
    %c0_i32_1 = arith.constant 0 : i32
    %c0_i32_2 = arith.constant 0 : i32
    return %arg0, %c0_i32, %c0_i32_0, %c0_i32_1 : i32, i32, i32, i32
  }
  func.func @transform_1(%arg0: i32, %arg1: i32) -> (i32, i32, i32) {
    %c0_i32 = arith.constant 0 : i32
    %c0_i32_0 = arith.constant 0 : i32
    %c0_i32_1 = arith.constant 0 : i32
    %c0_i32_2 = arith.constant 0 : i32
    return %c0_i32, %c0_i32_0, %c0_i32_1 : i32, i32, i32
  }
  func.func @transform_2(%arg0: i32, %arg1: i32) -> (i32, i32) {
    %c0_i32 = arith.constant 0 : i32
    %c0_i32_0 = arith.constant 0 : i32
    %c0_i32_1 = arith.constant 0 : i32
    return %c0_i32, %c0_i32_0 : i32, i32
  }
  func.func @transform_3(%arg0: i32, %arg1: i32) -> (i32, i32, i32) {
    %c0_i32 = arith.constant 0 : i32
    %c0_i32_0 = arith.constant 0 : i32
    return %arg0, %c0_i32, %arg1 : i32, i32, i32
  }
}

</mosaic_0001>

<bundles_post_ra>
// kernel: tpu_custom_call.1
= control target key start
LH: loop header
LB: loop body
LE: loop exit
PB: predicated region body
PF: predicated region fallthrough
CT: control target
= control target key end

     0   :  { %8 = vsyncpa [#allocation3], 0  ;;  %s2146_s0 = inlined_call_operand.hbm [shape: bf16[2,1,4,522], index: 0, kind: input, shape index: {}]   ;;  %s2147_s1 = inlined_call_operand.hbm [shape: bf16[9,8,4], index: 1, kind: input, shape index: {}]   ;;  %s2148_s2 = inlined_call_operand.hbm [shape: f32[8,1], index: 2, kind: input, shape index: {}]   ;;  %s2149_s3 = inlined_call_operand.hbm [shape: f32[2,8,384], index: 3, kind: output, shape index: {}]  }
   0x1   :  { %10 = vsyncpa [#allocation3 + $0x1], 0 }
   0x2   :  { %11 = vsyncpa [#allocation6], 0 }
   0x3   :  { %12 = vsyncpa [#allocation4], 0 }
   0x4   :  { %14 = vsyncpa [#allocation4 + $0x1], 0  ;;  %s1789_s12 = smov 0   ;;  %s1791_s13 = smov 0  }
   0x5   :  { %s1793_s14 = smov 0   ;;  %s1795_s15 = smov 0  }
   0x6   :  { %s1797_s16 = smov 0   ;;  %s1799_s17 = smov 0  }
   0x7 LB: > { %s1361_s18 = sadd.s32 4294967295, %s1749_s17   ;;  %s1362_s19 = sadd.s32 4294967294, %s1749_s17   ;;  %s1749_s17 = sphi %s1799_s17, %s20_s17   ;;  %s1745_s16 = sphi %s1797_s16, %s2171_s16   ;;  %s1741_s15 = sphi %s1795_s15, %s2170_s15   ;;  %s1737_s14 = sphi %s1793_s14, %s2169_s14   ;;  %s1733_s13 = sphi %s1791_s13, %s2168_s13   ;;  %s1729_s12 = sphi %s1789_s12, %s2167_s12  }
   0x8   : > { %p52_p0 = scmp.ne.s32.totalorder %s1733_s13, %s1729_s12  ;;  %p1823_p1 = scmp.eq.s32.totalorder %s1361_s18, 0 }
   0x9   : > { %p1827_p2 = scmp.eq.s32.totalorder %s1361_s18, 1  ;;  %p126_p3 = scmp.eq.s32.totalorder %s1362_s19, 1 }
   0xa   : > { %s2154_s20 = scalar_select %p1823_p1, 1, 0 }
   0xb   : > { %p1833_p4 = por %p1823_p1, %p52_p0  ;;  %p1363_p5 = scmp.ge.s32.totalorder %s1749_s17, 1 }
   0xc   : > { %p1838_p6 = por %p126_p3, %p52_p0  ;;  %p133_p7 = scmp.lt.s32.totalorder %s1749_s17, 3 }
   0xd   : > { %s2156_s22 = scalar_select %p1833_p4, 1, 0 }
   0xe   : > { %s2157_s23 = scalar_select %p1838_p6, 1, 0 }
   0xf   : > { %p1843_p8 = pnand %p1363_p5, %p133_p7  ;;  %s1751_s25 = smov [#allocation5]  }
  0x10   : > { %s145_s26 = sshll.u32 %s1751_s25, 4  ;;  %s1752_s28 = smov [#allocation7]   ;;  %s1847_s26 = int_to_ptr.vmem [resolvable:$true] %s145_s26 }
  0x11   : > { %p1490_p9 = pneg %p1843_p8  ;;  %s159_s29 = sshll.u32 %s1752_s28, 4  ;;  %s1858_s29 = int_to_ptr.vmem [resolvable:$true] %s159_s29 }
  0x12   : > { %s1577_s5 = scalar_lea.hbm %s2147_s1, 576 }
  0x13   : > { %p1854_p11 = pnand %p1490_p9, %p1823_p1  ;;  %p1578_p12 = scmp.ne.s32.totalorder %s2147_s1, %s1577_s5 }
  0x14   : > { %p1584_p5 = scmp.lt.u32.totalorder %s1577_s5, %s2147_s1 }
  0x15   : > { %p1579_p13 = pneg %p1854_p11 }
  0x17   : > { %p1580_p0 = pnand %p1579_p13, %p1578_p12 }
  0x19   : > { %p1581_p3 = pneg %p1580_p0 }
  0x1b   : > { %p1586_p7 = pnand %p1584_p5, %p1581_p3 }
  0x1d   : > { %1589 = shalt.err (!%p1586_p7)
}
  0x1e   : > { %s1590_s10 = scalar_lea.vmem %s1847_s26, 576  ;;  %p1598_p1 = scmp.lt.s32.totalorder %s1847_s26, %s1847_s26 }
  0x1f   : > { %p1591_p9 = scmp.ne.s32.totalorder %s1847_s26, %s1590_s10  ;;  %p1599_p12 = scmp.lt.s32.totalorder %s1590_s10, %s1590_s10 }
  0x21   : > { %p1593_p10 = pnand %p1591_p9, %p1579_p13  ;;  %p1600_p0 = por %p1599_p12, %p1598_p1 }
  0x23   : > { %p1594_p6 = pneg %p1593_p10 }
  0x25   : > { %p1601_p4 = pnand %p1600_p0, %p1594_p6 }
  0x27   : > { %1604 = shalt.err (!%p1601_p4)
}
  0x28   : > { %s1753_s11 = smov 64   ;;  %s1754_s18 = smov 4  }
  0x29   : > { %1493 = dma.hbm_to_vmem [thread:$0]  (!%p1854_p11), %s2147_s1, 576, %s1847_s26, [#allocation6], %s1753_s11, %s1753_s11, %s1754_s18  }
  0x2a   : > { %s1605_s4 = scalar_lea.hbm %s2148_s2, 128 }
  0x2b   : > { %p1606_p1 = scmp.ne.s32.totalorder %s2148_s2, %s1605_s4  ;;  %p1612_p10 = scmp.lt.u32.totalorder %s1605_s4, %s2148_s2 }
  0x2d   : > { %p1608_p4 = pnand %p1606_p1, %p1579_p13 }
  0x2f   : > { %p1609_p6 = pneg %p1608_p4 }
  0x31   : > { %p1614_p3 = pnand %p1612_p10, %p1609_p6 }
  0x33   : > { %1617 = shalt.err (!%p1614_p3)
}
  0x34   : > { %s1618_s26 = scalar_lea.vmem %s1858_s29, 128  ;;  %p1626_p12 = scmp.lt.s32.totalorder %s1858_s29, %s1858_s29 }
  0x35   : > { %p1619_p5 = scmp.ne.s32.totalorder %s1858_s29, %s1618_s26  ;;  %p1627_p0 = scmp.lt.s32.totalorder %s1618_s26, %s1618_s26 }
  0x37   : > { %p1621_p7 = pnand %p1619_p5, %p1579_p13  ;;  %p1628_p1 = por %p1627_p0, %p1626_p12 }
  0x39   : > { %p1622_p9 = pneg %p1621_p7 }
  0x3b   : > { %p1629_p4 = pnand %p1628_p1, %p1622_p9 }
  0x3d   : > { %1632 = shalt.err (!%p1629_p4)
}
  0x3e   : > { %1496 = dma.hbm_to_vmem [thread:$0]  (!%p1854_p11), %s2148_s2, 128, %s1858_s29, [#allocation6]  }
  0x3f   : > { %s32_s11 = sadd.s32 1, %s1745_s16  ;;  %s39_s18 = sadd.s32 1, %s1737_s14 }
  0x40   : > { %p34_p13 = scmp.ge.s32.totalorder %s32_s11, 2  ;;  %p46_p6 = scmp.ne.s32.totalorder %s1737_s14, %s1733_s13 }
  0x41   : > { %p47_p10 = scmp.eq.s32.totalorder %s1749_s17, 0  ;;  %p1507_p3 = scmp.lt.s32.totalorder %s1749_s17, 2 }
  0x42   : > { %s2173_s11 = smov (%p34_p13, %s32_s11), 0  ;;  %p1922_p7 = por %p1827_p2, %p46_p6 }
  0x43   : > { %p48_p5 = por %p47_p10, %p46_p6  ;;  %s36_s19 = ssub.s32 %s1745_s16, %s2173_s11 }
  0x44   : > { %s2160_s27 = scalar_select %p1922_p7, 1, 0 }
  0x45   : > { %s170_s25 = sand.u32 1, %s1737_s14   ;;  %p37_p9 = scmp.eq.s32.totalorder %s36_s19, 0 }
  0x46   : > { %s1473_s29 = smul.u32 10, %s170_s25  ;;  %p1929_p11 = pnand %p1507_p3, %p48_p5 }
  0x47   : > { %s1934_s30 = scalar_select %p37_p9, %s1737_s14, %s39_s18  }
  0x48   : > { %s1474_s4 = smul.u32 160, %s1745_s16  ;;  %s174_s5 = scalar_lea.vmem [#allocation2], %s1473_s29 }
  0x49   : > { %s182_s6 = sshll.u32 %s174_s5, 4  ;;  %s171_s26 = scalar_lea.sflag [#allocation3], %s170_s25  ;;  %s1942_s6 = int_to_ptr.vmem [resolvable:$true] %s182_s6 }
  0x4a   : > { %s1940_s8 = scalar_lea.hbm %s2146_s0, %s1474_s4  ;;  %p1635_p12 = pneg %p1929_p11 }
  0x4b   : > { %s1633_s9 = scalar_lea.hbm %s1940_s8, 160  ;;  %s1638_s19 = scalar_lea.hbm %s2146_s0, 320 }
  0x4c   : > { %p1634_p2 = scmp.ne.s32.totalorder %s1940_s8, %s1633_s9  ;;  %p1639_p4 = scmp.lt.u32.totalorder %s1940_s8, %s2146_s0 }
  0x4d   : > { %p1640_p13 = scmp.lt.u32.totalorder %s1638_s19, %s1633_s9  ;;  %p1642_p10 = scmp.lt.u32.totalorder %s1633_s9, %s1940_s8 }
  0x4e   : > { %p1636_p0 = pnand %p1635_p12, %p1634_p2 }
  0x4f   : > { %p1641_p6 = por %p1640_p13, %p1639_p4 }
  0x50   : > { %p1637_p1 = pneg %p1636_p0 }
  0x51   : > { %p1643_p3 = por %p1642_p10, %p1641_p6 }
  0x53   : > { %p1644_p5 = pnand %p1643_p3, %p1637_p1 }
  0x55   : > { %1647 = shalt.err (!%p1644_p5)
}
  0x56   : > { %s1648_s25 = scalar_lea.vmem %s1942_s6, 160  ;;  %s1755_s5 = smov [#allocation2]  }
  0x57   : > { %p1649_p9 = scmp.ne.s32.totalorder %s1942_s6, %s1648_s25  ;;  %s1653_s21 = sshll.u32 %s1755_s5, 4  ;;  %s1654_s21 = int_to_ptr.vmem [resolvable:$false] %s1653_s21 }
  0x58   : > { %s1655_s7 = scalar_lea.vmem %s1654_s21, 320  ;;  %p1656_p7 = scmp.lt.s32.totalorder %s1942_s6, %s1654_s21 }
  0x59   : > { %p1651_p2 = pnand %p1649_p9, %p1635_p12  ;;  %p1657_p4 = scmp.lt.s32.totalorder %s1655_s7, %s1648_s25 }
  0x5b   : > { %p1652_p0 = pneg %p1651_p2  ;;  %p1658_p13 = por %p1657_p4, %p1656_p7 }
  0x5d   : > { %p1659_p6 = pnand %p1658_p13, %p1652_p0 }
  0x5f   : > { %1662 = shalt.err (!%p1659_p6)
}
  0x60   : > { %1500 = dma.hbm_to_vmem [thread:$0]  (!%p1929_p11), %s1940_s8, 160, %s1942_s6, %s171_s26  }
  0x61   : > { %191 = sbr.rel (%p1843_p8) target bundleno = 538 (0x21a), region = 32  ;;  %s1972_s9 = sand.u32 (!%p1843_p8), 1, %s1733_s13  }
  0x62   : > { %s1475_s10 = smul.u32 (!%p1843_p8), 10, %s1972_s9  ;;  %s194_s18 = scalar_lea.sflag (!%p1843_p8), [#allocation3], %s1972_s9 }
  0x63   : > { %p2162_p7 = scmp.ne.s32.totalorder (!%p1843_p8), %s2156_s22, 0 }
  0x64   : > { %s197_s19 = scalar_lea.vmem (!%p1843_p8), [#allocation2], %s1475_s10 }
  0x68   : > { %1716 = dma.done.wait (%p2162_p7), %s194_s18, 160  }
  0x69   : > { %1718 = vsyncadd (%p2162_p7), %s194_s18, 4294967136  ;;  %p2163_p12 = scmp.ne.s32.totalorder %s2154_s20, 0 }
  0x6b   : > { %1720 = dma.done.wait (%p2163_p12), [#allocation6], 704  }
  0x6c   : > { %1722 = vsyncadd (%p2163_p12), [#allocation6], 4294966592  ;;  %v244_v0 = vlaneseq  ;;  %v1756_v1 = vmov 1983009808   ;;  %v1757_v5 = vmov 0.0   ;;  %v1758_v6 = vmov 0  }
  0x6d   : > { %v242_v2 = vunpack.c.l.s4 %v1756_v1  ;;  %1419 = vmatprep.subr.bf16.mxu1 %v1757_v5  ;;  %315 = vmatprep.mubr.bf16.mxu0 %v1758_v6  ;;  %v235_v8 = vld [vmem:[%s197_s19] sm:$0xff]  ;;  %vm1759_vm0 = vmmov 0   ;;  %s1760_s20 = smov 127   ;;  %s1761_s22 = smov 126   ;;  %v1227_v14 = vld [vmem:[#allocation7] sm:$0xff]  ;;  %vm265_vm1 = vcmask 1039360  }
  0x6e   : > { %v245_v3 = vshrl.u32 %v244_v0, 7  ;;  %1575 = vset.pattern.permute.xlu0 %v1758_v6  ;;  %1421 = vmatprep.mubr.msk.bf16.mxu1 %vm1759_vm0, %v1757_v5  ;;  %v240_v10 = vcombine.high %v235_v8, %v235_v8  ;;  %s1762_s24 = smov 110   ;;  %s1763_s28 = smov 109   ;;  %vm273_vm2 = vcmask 1041408   ;;  %v238_v23 = vld [vmem:[#allocation5 + $0x4] sm:$0xf] }
  0x6f   : > { %v243_v4 = vunpack.c.0.s8 %v242_v2  ;;  %s1764_s6 = smov 108   ;;  %s1765_s8 = smov 92   ;;  %vm269_vm3 = vcmask 31744   ;;  %vm467_vm4 = vcmask 1031168   ;;  %v236_v34 = vld [vmem:[#allocation5] sm:$0xf] }
  0x70   : > { %s1766_s26 = smov 91   ;;  %s1767_s29 = smov 90   ;;  %vm577_vm5 = vcmask 900096   ;;  %v458_v44 = vld [vmem:[#allocation5 + $0x8] sm:$0xf]  ;;  %vm687_vm6 = vcmask 891904  }
  0x71   : > { %v246_v7 = vsub.s32 %v243_v4, %v245_v3  ;;  %v568_v54 = vld [vmem:[#allocation5 + $0xc] sm:$0xf]  ;;  %vm797_vm7 = vcmask 883712   ;;  %v678_v0 = vld [vmem:[#allocation5 + $0x10] sm:$0xf]  ;;  %vm907_vm8 = vcmask 752640  }
  0x72   : > { %vm1017_vm9 = vcmask 744448   ;;  %vm1127_vm10 = vcmask 736256   ;;  %s1476_s4 = smul.u32 24, %s1972_s9  ;;  %p2164_p11 = scmp.ne.s32.totalorder %s2160_s27, 0 }
  0x73   : > { %v1989_v9 = vrot.slane %v235_v8, %v246_v7  ;;  %v1992_v11 = vrot.slane %v240_v10, %v246_v7  ;;  %s1477_s25 = smul.u32 384, %s1741_s15  ;;  %s1243_s15 = scalar_lea.sflag [#allocation4], %s1972_s9 }
  0x74   : > { %s227_s5 = scalar_lea.vmem [#allocation8], %s1476_s4 }
  0x75   : > { %257 = vrot.lane.b32.xlu0 %v1989_v9, %s1760_s20  ;;  %v255_v12 = vcombine.high %v1989_v9, %v1989_v9  ;;  %261 = vrot.lane.b32.xlu1 %v1992_v11, %s1760_s20  ;;  %v256_v13 = vcombine.high %v1992_v11, %v1992_v11  ;;  %v368_v26 = vsel %vm273_vm2, %v1989_v9, 0  ;;  %v374_v27 = vsel %vm273_vm2, %v1992_v11, 0  ;;  %s1259_s21 = sshll.u32 %s227_s5, 4  ;;  %s2097_s18 = scalar_lea.hbm %s2149_s3, %s1477_s25  ;;  %s2099_s21 = int_to_ptr.vmem [resolvable:$true] %s1259_s21 }
  0x76   : > { %s1663_s19 = scalar_lea.vmem %s2099_s21, 384 }
  0x77   : > { %p1664_p8 = scmp.ne.s32.totalorder %s2099_s21, %s1663_s19 }
  0x79   : > { %259 = vrot.lane.b32.xlu0 %v255_v12, %s1760_s20  ;;  %263 = vrot.lane.b32.xlu1 %v256_v13, %s1760_s20  ;;  %p1665_p1 = pnand %p1664_p8, %p2164_p11  ;;  %s1768_s20 = smov [#allocation8]  }
  0x7b   : > { %p1666_p10 = pneg %p1665_p1 }
  0x7d   : > { %459 = vrot.lane.b32.xlu0 %v1989_v9, %s1761_s22  ;;  %461 = vrot.lane.b32.xlu1 %v255_v12, %s1761_s22 }
  0x81   : > { %463 = vrot.lane.b32.xlu0 %v1992_v11, %s1761_s22  ;;  %465 = vrot.lane.b32.xlu1 %v256_v13, %s1761_s22  ;;  %s1667_s22 = sshll.u32 %s1768_s20, 4  ;;  %s1668_s22 = int_to_ptr.vmem [resolvable:$false] %s1667_s22 }
  0x82   : > { %p1670_p3 = scmp.lt.s32.totalorder %s2099_s21, %s1668_s22 }
  0x85   : > { %569 = vrot.lane.b32.xlu0 %v1989_v9, %s1762_s24  ;;  %571 = vrot.lane.b32.xlu1 %v255_v12, %s1762_s24 }
  0x89   : > { %573 = vrot.lane.b32.xlu0 %v1992_v11, %s1762_s24  ;;  %575 = vrot.lane.b32.xlu1 %v256_v13, %s1762_s24  ;;  %s1669_s24 = scalar_lea.vmem %s1668_s22, 768 }
  0x8a   : > { %p1671_p5 = scmp.lt.s32.totalorder %s1669_s24, %s1663_s19 }
  0x8c   : > { %p1672_p9 = por %p1671_p5, %p1670_p3 }
  0x8d   : > { %679 = vrot.lane.b32.xlu0 %v1989_v9, %s1763_s28  ;;  %681 = vrot.lane.b32.xlu1 %v255_v12, %s1763_s28 }
  0x8e   : > { %p1673_p2 = pnand %p1672_p9, %p1666_p10 }
  0x91   : > { %683 = vrot.lane.b32.xlu0 %v1992_v11, %s1763_s28  ;;  %685 = vrot.lane.b32.xlu1 %v256_v13, %s1763_s28 }
  0x95   : > { %789 = vrot.lane.b32.xlu0 %v1989_v9, %s1764_s6  ;;  %791 = vrot.lane.b32.xlu1 %v255_v12, %s1764_s6 }
  0x99   : > { %793 = vrot.lane.b32.xlu0 %v1992_v11, %s1764_s6  ;;  %795 = vrot.lane.b32.xlu1 %v256_v13, %s1764_s6 }
  0x9d   : > { %899 = vrot.lane.b32.xlu0 %v1989_v9, %s1765_s8  ;;  %901 = vrot.lane.b32.xlu1 %v255_v12, %s1765_s8 }
  0xa1   : > { %903 = vrot.lane.b32.xlu0 %v1992_v11, %s1765_s8  ;;  %905 = vrot.lane.b32.xlu1 %v256_v13, %s1765_s8 }
  0xa5   : > { %1009 = vrot.lane.b32.xlu0 %v1989_v9, %s1766_s26  ;;  %1011 = vrot.lane.b32.xlu1 %v255_v12, %s1766_s26 }
  0xa9   : > { %1013 = vrot.lane.b32.xlu0 %v1992_v11, %s1766_s26  ;;  %1015 = vrot.lane.b32.xlu1 %v256_v13, %s1766_s26 }
  0xad   : > { %1119 = vrot.lane.b32.xlu0 %v1989_v9, %s1767_s29  ;;  %1121 = vrot.lane.b32.xlu1 %v255_v12, %s1767_s29 }
  0xb1   : > { %1123 = vrot.lane.b32.xlu0 %v1992_v11, %s1767_s29  ;;  %1125 = vrot.lane.b32.xlu1 %v256_v13, %s1767_s29 }
  0xb5   : > { %1230 = vperm.xlu0 %1575, %v1227_v14  }
  0xe7   : > { %v258_v15 = vpop.permute.xlu0 %257  ;;  %v262_v16 = vpop.permute.xlu1 %261 }
  0xeb   : > { %v260_v17 = vpop.permute.xlu0 %259  ;;  %v264_v20 = vpop.permute.xlu1 %263 }
  0xec   : > { %v267_v18 = vsel %vm265_vm1, %v260_v17, %v262_v16  ;;  %v266_v19 = vsel %vm265_vm1, %v258_v15, %v260_v17  ;;  %v268_v22 = vsel %vm265_vm1, %v262_v16, %v264_v20 }
  0xed   : > { %1371 = vmatprep.subr.msk.bf16.mxu0 %vm273_vm2, %v267_v18  ;;  %v275_v21 = vsel %vm273_vm2, %v266_v19, 0  ;;  %v281_v24 = vsel %vm273_vm2, %v268_v22, 0  ;;  %v898_v22 = vld [vmem:[#allocation5 + $0x18] sm:$0xf] }
  0xee   : > { %284 = vmatpush1.bf16.msra.mxu0 %v275_v21  ;;  %1420 = vmatpush3.bf16.msra.mxu1 %v281_v24 }
  0xef   : > { %v460_v25 = vpop.permute.xlu0 %459  ;;  %1374 = vmatprep.subr.msk.bf16.mxu0 %vm273_vm2, %v255_v12  ;;  %1425 = vmatprep.subr.bf16.mxu1 %v1757_v5  ;;  %v462_v28 = vpop.permute.xlu1 %461  ;;  %v788_v12 = vld [vmem:[#allocation5 + $0x14] sm:$0xf] }
  0xf0   : > { %v468_v30 = vsel %vm467_vm4, %v460_v25, %v462_v28 }
  0xf1   : > { %1372 = vmatmul.mubr.msk.bf16.vlgmr.msra.gmra.mrb[0].mxu0 %vm269_vm3, %v238_v23  ;;  %1422 = vmatmul.mubr.msk.bf16.vlgmr.msra.gmra.mrb[0].mxu1 %vm269_vm3, %v238_v23  ;;  %v475_v35 = vsel %vm273_vm2, %v468_v30, 0 }
  0xf2   : > { %377 = vmatpush1.bf16.msra.mxu0 %v368_v26  ;;  %408 = vmatprep.mubr.bf16.mxu0 %v1758_v6 }
  0xf3   : > { %v464_v29 = vpop.permute.xlu0 %463  ;;  %1426 = vmatpush3.bf16.msra.mxu1 %v374_v27  ;;  %1427 = vmatprep.mubr.msk.bf16.mxu1 %vm1759_vm0, %v1757_v5  ;;  %v466_v32 = vpop.permute.xlu1 %465 }
  0xf4   : > { %v469_v31 = vsel %vm467_vm4, %v462_v28, %v464_v29  ;;  %1431 = vmatprep.subr.bf16.mxu1 %v1757_v5  ;;  %v470_v33 = vsel %vm467_vm4, %v464_v29, %v466_v32  ;;  %v1008_v32 = vld [vmem:[#allocation5 + $0x1c] sm:$0xf] }
  0xf5   : > { %1377 = vmatprep.subr.msk.bf16.mxu0 %vm273_vm2, %v469_v31  ;;  %v481_v37 = vsel %vm273_vm2, %v470_v33, 0 }
  0xf7   : > { %v570_v36 = vpop.permute.xlu0 %569  ;;  %v572_v38 = vpop.permute.xlu1 %571 }
  0xf8   : > { %v578_v40 = vsel %vm577_vm5, %v570_v36, %v572_v38 }
  0xf9   : > { %1375 = vmatmul.mubr.msk.bf16.vlgmr.msra.gmra.mrb[4].mxu0 %vm269_vm3, %v236_v34  ;;  %1428 = vmatmul.mubr.msk.bf16.vlgmr.msra.gmra.mrb[4].mxu1 %vm269_vm3, %v236_v34  ;;  %v585_v45 = vsel %vm273_vm2, %v578_v40, 0 }
  0xfa   : > { %484 = vmatpush1.bf16.msra.mxu0 %v475_v35  ;;  %515 = vmatprep.mubr.bf16.mxu0 %v1758_v6  ;;  %v1118_v35 = vld [vmem:[#allocation5 + $0x20] sm:$0xf] }
  0xfb   : > { %v574_v39 = vpop.permute.xlu0 %573  ;;  %1432 = vmatpush3.bf16.msra.mxu1 %v481_v37  ;;  %1433 = vmatprep.mubr.msk.bf16.mxu1 %vm1759_vm0, %v1757_v5  ;;  %v576_v42 = vpop.permute.xlu1 %575 }
  0xfc   : > { %v579_v41 = vsel %vm577_vm5, %v572_v38, %v574_v39  ;;  %1437 = vmatprep.subr.bf16.mxu1 %v1757_v5  ;;  %v580_v43 = vsel %vm577_vm5, %v574_v39, %v576_v42 }
  0xfd   : > { %1380 = vmatprep.subr.msk.bf16.mxu0 %vm273_vm2, %v579_v41  ;;  %v591_v47 = vsel %vm273_vm2, %v580_v43, 0 }
  0xff   : > { %v680_v46 = vpop.permute.xlu0 %679  ;;  %v682_v48 = vpop.permute.xlu1 %681 }
 0x100   : > { %v688_v50 = vsel %vm687_vm6, %v680_v46, %v682_v48 }
 0x101   : > { %1378 = vmatmul.mubr.msk.bf16.vlgmr.msra.gmra.mrb[8].mxu0 %vm269_vm3, %v458_v44  ;;  %1434 = vmatmul.mubr.msk.bf16.vlgmr.msra.gmra.mrb[8].mxu1 %vm269_vm3, %v458_v44  ;;  %v695_v55 = vsel %vm273_vm2, %v688_v50, 0 }
 0x102   : > { %594 = vmatpush1.bf16.msra.mxu0 %v585_v45  ;;  %625 = vmatprep.mubr.bf16.mxu0 %v1758_v6 }
 0x103   : > { %v684_v49 = vpop.permute.xlu0 %683  ;;  %1438 = vmatpush3.bf16.msra.mxu1 %v591_v47  ;;  %1439 = vmatprep.mubr.msk.bf16.mxu1 %vm1759_vm0, %v1757_v5  ;;  %v686_v52 = vpop.permute.xlu1 %685 }
 0x104   : > { %v689_v51 = vsel %vm687_vm6, %v682_v48, %v684_v49  ;;  %1443 = vmatprep.subr.bf16.mxu1 %v1757_v5  ;;  %v690_v53 = vsel %vm687_vm6, %v684_v49, %v686_v52 }
 0x105   : > { %1383 = vmatprep.subr.msk.bf16.mxu0 %vm273_vm2, %v689_v51  ;;  %v701_v57 = vsel %vm273_vm2, %v690_v53, 0 }
 0x107   : > { %v790_v56 = vpop.permute.xlu0 %789  ;;  %v792_v58 = vpop.permute.xlu1 %791 }
 0x108   : > { %v798_v60 = vsel %vm797_vm7, %v790_v56, %v792_v58 }
 0x109   : > { %1381 = vmatmul.mubr.msk.bf16.vlgmr.msra.gmra.mrb[12].mxu0 %vm269_vm3, %v568_v54  ;;  %1440 = vmatmul.mubr.msk.bf16.vlgmr.msra.gmra.mrb[12].mxu1 %vm269_vm3, %v568_v54  ;;  %v805_v1 = vsel %vm273_vm2, %v798_v60, 0 }
 0x10a   : > { %704 = vmatpush1.bf16.msra.mxu0 %v695_v55  ;;  %735 = vmatprep.mubr.bf16.mxu0 %v1758_v6 }
 0x10b   : > { %v794_v59 = vpop.permute.xlu0 %793  ;;  %1444 = vmatpush3.bf16.msra.mxu1 %v701_v57  ;;  %1445 = vmatprep.mubr.msk.bf16.mxu1 %vm1759_vm0, %v1757_v5  ;;  %v796_v62 = vpop.permute.xlu1 %795 }
 0x10c   : > { %v799_v61 = vsel %vm797_vm7, %v792_v58, %v794_v59  ;;  %1449 = vmatprep.subr.bf16.mxu1 %v1757_v5  ;;  %v800_v63 = vsel %vm797_vm7, %v794_v59, %v796_v62 }
 0x10d   : > { %1386 = vmatprep.subr.msk.bf16.mxu0 %vm273_vm2, %v799_v61  ;;  %v811_v3 = vsel %vm273_vm2, %v800_v63, 0 }
 0x10f   : > { %v900_v2 = vpop.permute.xlu0 %899  ;;  %v902_v4 = vpop.permute.xlu1 %901 }
 0x110   : > { %v908_v8 = vsel %vm907_vm8, %v900_v2, %v902_v4 }
 0x111   : > { %1384 = vmatmul.mubr.msk.bf16.vlgmr.msra.gmra.mrb[16].mxu0 %vm269_vm3, %v678_v0  ;;  %1446 = vmatmul.mubr.msk.bf16.vlgmr.msra.gmra.mrb[16].mxu1 %vm269_vm3, %v678_v0  ;;  %v915_v13 = vsel %vm273_vm2, %v908_v8, 0 }
 0x112   : > { %814 = vmatpush1.bf16.msra.mxu0 %v805_v1  ;;  %845 = vmatprep.mubr.bf16.mxu0 %v1758_v6 }
 0x113   : > { %v904_v7 = vpop.permute.xlu0 %903  ;;  %1450 = vmatpush3.bf16.msra.mxu1 %v811_v3  ;;  %1451 = vmatprep.mubr.msk.bf16.mxu1 %vm1759_vm0, %v1757_v5  ;;  %v906_v10 = vpop.permute.xlu1 %905 }
 0x114   : > { %v909_v9 = vsel %vm907_vm8, %v902_v4, %v904_v7  ;;  %1455 = vmatprep.subr.bf16.mxu1 %v1757_v5  ;;  %v910_v11 = vsel %vm907_vm8, %v904_v7, %v906_v10 }
 0x115   : > { %1389 = vmatprep.subr.msk.bf16.mxu0 %vm273_vm2, %v909_v9  ;;  %v921_v15 = vsel %vm273_vm2, %v910_v11, 0 }
 0x117   : > { %v1010_v14 = vpop.permute.xlu0 %1009  ;;  %v1012_v16 = vpop.permute.xlu1 %1011 }
 0x118   : > { %v1018_v18 = vsel %vm1017_vm9, %v1010_v14, %v1012_v16 }
 0x119   : > { %1387 = vmatmul.mubr.msk.bf16.vlgmr.msra.gmra.mrb[20].mxu0 %vm269_vm3, %v788_v12  ;;  %1452 = vmatmul.mubr.msk.bf16.vlgmr.msra.gmra.mrb[20].mxu1 %vm269_vm3, %v788_v12  ;;  %v1025_v23 = vsel %vm273_vm2, %v1018_v18, 0 }
 0x11a   : > { %924 = vmatpush1.bf16.msra.mxu0 %v915_v13  ;;  %955 = vmatprep.mubr.bf16.mxu0 %v1758_v6 }
 0x11b   : > { %v1014_v17 = vpop.permute.xlu0 %1013  ;;  %1456 = vmatpush3.bf16.msra.mxu1 %v921_v15  ;;  %1457 = vmatprep.mubr.msk.bf16.mxu1 %vm1759_vm0, %v1757_v5  ;;  %v1016_v20 = vpop.permute.xlu1 %1015 }
 0x11c   : > { %v1019_v19 = vsel %vm1017_vm9, %v1012_v16, %v1014_v17  ;;  %1461 = vmatprep.subr.bf16.mxu1 %v1757_v5  ;;  %v1020_v21 = vsel %vm1017_vm9, %v1014_v17, %v1016_v20 }
 0x11d   : > { %1392 = vmatprep.subr.msk.bf16.mxu0 %vm273_vm2, %v1019_v19  ;;  %v1031_v25 = vsel %vm273_vm2, %v1020_v21, 0 }
 0x11f   : > { %v1120_v24 = vpop.permute.xlu0 %1119  ;;  %v1122_v26 = vpop.permute.xlu1 %1121 }
 0x120   : > { %v1128_v28 = vsel %vm1127_vm10, %v1120_v24, %v1122_v26 }
 0x121   : > { %1390 = vmatmul.mubr.msk.bf16.vlgmr.msra.gmra.mrb[24].mxu0 %vm269_vm3, %v898_v22  ;;  %1458 = vmatmul.mubr.msk.bf16.vlgmr.msra.gmra.mrb[24].mxu1 %vm269_vm3, %v898_v22  ;;  %v1135_v33 = vsel %vm273_vm2, %v1128_v28, 0 }
 0x122   : > { %1034 = vmatpush1.bf16.msra.mxu0 %v1025_v23  ;;  %1065 = vmatprep.mubr.bf16.mxu0 %v1758_v6 }
 0x123   : > { %v1124_v27 = vpop.permute.xlu0 %1123  ;;  %1462 = vmatpush3.bf16.msra.mxu1 %v1031_v25  ;;  %1463 = vmatprep.mubr.msk.bf16.mxu1 %vm1759_vm0, %v1757_v5  ;;  %v1126_v30 = vpop.permute.xlu1 %1125 }
 0x124   : > { %v1129_v29 = vsel %vm1127_vm10, %v1122_v26, %v1124_v27  ;;  %1467 = vmatprep.subr.bf16.mxu1 %v1757_v5  ;;  %v1130_v31 = vsel %vm1127_vm10, %v1124_v27, %v1126_v30 }
 0x125   : > { %1395 = vmatprep.subr.msk.bf16.mxu0 %vm273_vm2, %v1129_v29  ;;  %v1141_v34 = vsel %vm273_vm2, %v1130_v31, 0 }
 0x129   : > { %1393 = vmatmul.mubr.msk.bf16.vlgmr.msra.gmra.mrb[28].mxu0 %vm269_vm3, %v1008_v32  ;;  %1464 = vmatmul.mubr.msk.bf16.vlgmr.msra.gmra.mrb[28].mxu1 %vm269_vm3, %v1008_v32 }
 0x12a   : > { %1144 = vmatpush1.bf16.msra.mxu0 %v1135_v33  ;;  %1175 = vmatprep.mubr.bf16.mxu0 %v1758_v6 }
 0x12b   : > { %1468 = vmatpush3.bf16.msra.mxu1 %v1141_v34  ;;  %1469 = vmatprep.mubr.msk.bf16.mxu1 %vm1759_vm0, %v1757_v5 }
 0x131   : > { %1396 = vmatmul.mubr.msk.bf16.vlgmr.msra.gmra.mrb[32].mxu0 %vm269_vm3, %v1118_v35  ;;  %1470 = vmatmul.mubr.msk.bf16.vlgmr.msra.gmra.mrb[32].mxu1 %vm269_vm3, %v1118_v35 }
 0x1c4   : > { %v317_v36 = vpop.f32.mrb[0].mxu0  ;;  %v358_v39 = vpop.f32.mrb[0].mxu1 }
 0x1c5   : > { %v319_v37 = vpop.f32.mrb[1].mxu0  ;;  %v1423_v41 = vpop.f32.mrb[1].mxu1 }
 0x1c6   : > { %v321_v38 = vpop.f32.mrb[2].mxu0  ;;  %v361_v42 = vpop.f32.mrb[2].mxu1 }
 0x1c7   : > { %v322_v40 = vpop.f32.mrb[3].mxu0  ;;  %v1424_v43 = vpop.f32.mrb[3].mxu1 }
 0x1cc   : > { %v410_v6 = vpop.f32.mrb[4].mxu0  ;;  %v451_v48 = vpop.f32.mrb[4].mxu1 }
 0x1cd   : > { %v411_v44 = vadd.f32 %v410_v6, %v317_v36  ;;  %v412_v45 = vpop.f32.mrb[5].mxu0  ;;  %v452_v5 = vadd.f32 %v451_v48, %v358_v39  ;;  %v1429_v50 = vpop.f32.mrb[5].mxu1 }
 0x1ce   : > { %v413_v46 = vadd.f32 %v412_v45, %v319_v37  ;;  %v414_v47 = vpop.f32.mrb[6].mxu0  ;;  %v454_v51 = vpop.f32.mrb[6].mxu1 }
 0x1cf   : > { %v415_v49 = vpop.f32.mrb[7].mxu0  ;;  %v1430_v52 = vpop.f32.mrb[7].mxu1 }
 0x1d4   : > { %v517_v53 = vpop.f32.mrb[8].mxu0  ;;  %v558_v58 = vpop.f32.mrb[8].mxu1 }
 0x1d5   : > { %v564_v54 = vadd.f32 %v517_v53, %v411_v44  ;;  %v519_v55 = vpop.f32.mrb[9].mxu0  ;;  %v566_v59 = vadd.f32 %v558_v58, %v452_v5  ;;  %v1435_v61 = vpop.f32.mrb[9].mxu1 }
 0x1d6   : > { %v565_v56 = vadd.f32 %v519_v55, %v413_v46  ;;  %v521_v57 = vpop.f32.mrb[10].mxu0  ;;  %v561_v62 = vpop.f32.mrb[10].mxu1 }
 0x1d7   : > { %v522_v60 = vpop.f32.mrb[11].mxu0  ;;  %v1436_v63 = vpop.f32.mrb[11].mxu1 }
 0x1dc   : > { %v627_v0 = vpop.f32.mrb[12].mxu0  ;;  %v668_v7 = vpop.f32.mrb[12].mxu1 }
 0x1dd   : > { %v674_v1 = vadd.f32 %v627_v0, %v564_v54  ;;  %v629_v2 = vpop.f32.mrb[13].mxu0  ;;  %v676_v8 = vadd.f32 %v668_v7, %v566_v59  ;;  %v1441_v10 = vpop.f32.mrb[13].mxu1 }
 0x1de   : > { %v675_v3 = vadd.f32 %v629_v2, %v565_v56  ;;  %v631_v4 = vpop.f32.mrb[14].mxu0  ;;  %v671_v11 = vpop.f32.mrb[14].mxu1 }
 0x1df   : > { %v632_v9 = vpop.f32.mrb[15].mxu0  ;;  %v1442_v12 = vpop.f32.mrb[15].mxu1 }
 0x1e0   : > { %v1231_v56 = vpop.permute.xlu0 %1230 }
 0x1e4   : > { %v737_v13 = vpop.f32.mrb[16].mxu0  ;;  %v778_v18 = vpop.f32.mrb[16].mxu1 }
 0x1e5   : > { %v784_v14 = vadd.f32 %v737_v13, %v674_v1  ;;  %v739_v15 = vpop.f32.mrb[17].mxu0  ;;  %v786_v19 = vadd.f32 %v778_v18, %v676_v8  ;;  %v1447_v21 = vpop.f32.mrb[17].mxu1 }
 0x1e6   : > { %v785_v16 = vadd.f32 %v739_v15, %v675_v3  ;;  %v741_v17 = vpop.f32.mrb[18].mxu0  ;;  %v781_v22 = vpop.f32.mrb[18].mxu1 }
 0x1e7   : > { %v742_v20 = vpop.f32.mrb[19].mxu0  ;;  %v1448_v23 = vpop.f32.mrb[19].mxu1 }
 0x1ec   : > { %v847_v24 = vpop.f32.mrb[20].mxu0  ;;  %v888_v29 = vpop.f32.mrb[20].mxu1 }
 0x1ed   : > { %v894_v25 = vadd.f32 %v847_v24, %v784_v14  ;;  %v849_v26 = vpop.f32.mrb[21].mxu0  ;;  %v896_v30 = vadd.f32 %v888_v29, %v786_v19  ;;  %v1453_v32 = vpop.f32.mrb[21].mxu1 }
 0x1ee   : > { %v895_v27 = vadd.f32 %v849_v26, %v785_v16  ;;  %v851_v28 = vpop.f32.mrb[22].mxu0  ;;  %v891_v33 = vpop.f32.mrb[22].mxu1 }
 0x1ef   : > { %v852_v31 = vpop.f32.mrb[23].mxu0  ;;  %v1454_v34 = vpop.f32.mrb[23].mxu1 }
 0x1f4   : > { %v957_v35 = vpop.f32.mrb[24].mxu0  ;;  %v998_v40 = vpop.f32.mrb[24].mxu1 }
 0x1f5   : > { %v1004_v36 = vadd.f32 %v957_v35, %v894_v25  ;;  %v959_v37 = vpop.f32.mrb[25].mxu0  ;;  %v1006_v41 = vadd.f32 %v998_v40, %v896_v30  ;;  %v1459_v43 = vpop.f32.mrb[25].mxu1 }
 0x1f6   : > { %v1005_v38 = vadd.f32 %v959_v37, %v895_v27  ;;  %v961_v39 = vpop.f32.mrb[26].mxu0  ;;  %v1001_v6 = vpop.f32.mrb[26].mxu1 }
 0x1f7   : > { %v962_v42 = vpop.f32.mrb[27].mxu0  ;;  %v1460_v44 = vpop.f32.mrb[27].mxu1 }
 0x1fc   : > { %v1067_v45 = vpop.f32.mrb[28].mxu0  ;;  %v1108_v49 = vpop.f32.mrb[28].mxu1 }
 0x1fd   : > { %v1114_v46 = vadd.f32 %v1067_v45, %v1004_v36  ;;  %v1069_v47 = vpop.f32.mrb[29].mxu0  ;;  %v1116_v50 = vadd.f32 %v1108_v49, %v1006_v41  ;;  %v1465_v52 = vpop.f32.mrb[29].mxu1 }
 0x1fe   : > { %v1115_v48 = vadd.f32 %v1069_v47, %v1005_v38  ;;  %v1071_v5 = vpop.f32.mrb[30].mxu0  ;;  %v1111_v53 = vpop.f32.mrb[30].mxu1 }
 0x1ff   : > { %v1072_v51 = vpop.f32.mrb[31].mxu0  ;;  %v1466_v54 = vpop.f32.mrb[31].mxu1 }
 0x204   : > { %v1177_v55 = vpop.f32.mrb[32].mxu0  ;;  %v1218_v61 = vpop.f32.mrb[32].mxu1 }
 0x205   : > { %v1224_v57 = vadd.f32 %v1177_v55, %v1114_v46  ;;  %v1179_v58 = vpop.f32.mrb[33].mxu0  ;;  %v1226_v63 = vadd.f32 %v1218_v61, %v1116_v50  ;;  %v1471_v1 = vpop.f32.mrb[33].mxu1 }
 0x206   : > { %v1225_v59 = vadd.f32 %v1179_v58, %v1115_v48  ;;  %v1181_v60 = vpop.f32.mrb[34].mxu0  ;;  %v1221_v3 = vpop.f32.mrb[34].mxu1 }
 0x207   : > { %v1233_v62 = vadd.f32 %v1231_v56, %v1224_v57  ;;  %v1182_v0 = vpop.f32.mrb[35].mxu0  ;;  %v1235_v7 = vadd.f32 %v1231_v56, %v1226_v63  ;;  %v1472_v8 = vpop.f32.mrb[35].mxu1 }
 0x208   : > { %v1234_v2 = vadd.f32 %v1231_v56, %v1225_v59 }
 0x209   : > { %v1236_v4 = vmax.f32 %v1233_v62, 0.0  ;;  %v1238_v10 = vmax.f32 %v1235_v7, 0.0 }
 0x20a   : > { %v1237_v9 = vmax.f32 %v1234_v2, 0.0 }
 0x20b   : > { %1239 = vst [vmem:[%s227_s5] sm:$0xff] %v1236_v4  ;;  %1241 = vst [vmem:[%s227_s5 + $0x10] sm:$0xff] %v1238_v10 }
 0x20c   : > { %1240 = vst [vmem:[%s227_s5 + $0x8] sm:$0xff] %v1237_v9 }
 0x20d   : > { %1676 = shalt.err (!%p1673_p2)
}
 0x20e   : > { %s1677_s9 = scalar_lea.hbm %s2097_s18, 384  ;;  %s1681_s8 = scalar_lea.hbm %s2149_s3, 768 }
 0x20f   : > { %p1678_p0 = scmp.ne.s32.totalorder %s2097_s18, %s1677_s9  ;;  %p1682_p6 = scmp.lt.u32.totalorder %s2097_s18, %s2149_s3 }
 0x210   : > { %p1683_p7 = scmp.lt.u32.totalorder %s1681_s8, %s1677_s9  ;;  %p1685_p8 = scmp.lt.u32.totalorder %s1677_s9, %s2097_s18 }
 0x211   : > { %p1679_p4 = pnand %p1678_p0, %p2164_p11 }
 0x212   : > { %p1684_p12 = por %p1683_p7, %p1682_p6 }
 0x213   : > { %p1680_p13 = pneg %p1679_p4 }
 0x214   : > { %p1686_p1 = por %p1685_p8, %p1684_p12 }
 0x216   : > { %p1687_p10 = pnand %p1686_p1, %p1680_p13 }
 0x218   : > { %1690 = shalt.err (!%p1687_p10)
}
 0x219   : > { %1488 = dma.vmem_to_hbm [thread:$0]  (%p2164_p11), %s2099_s21, 384, %s2097_s18, %s1243_s15  }
 0x21a PF: > { %s1271_s4 = sand.u32 1, %s1729_s12   ;;  %p2165_p3 = scmp.ne.s32.totalorder %s2157_s23, 0 }
 0x21b   : > { %p2166_p5 = scmp.ge.s32.totalorder %s1749_s17, 2  ;;  %s1272_s25 = scalar_lea.sflag [#allocation4], %s1271_s4 }
 0x21d   : > { %p1502_p9 = pnand %p2166_p5, %p2165_p3 }
 0x21f   : > { %1724 = dma.done.wait (!%p1502_p9), %s1272_s25, 384  }
 0x220   : > { %1726 = vsyncadd (!%p1502_p9), %s1272_s25, 4294966912  ;;  %s20_s17 = sadd.s32 1, %s1749_s17   ;;  %s2167_s12 = smov %s1733_s13 }
 0x221   : > { %p17_p2 = scmp.ge.s32.totalorder %s20_s17, 4   ;;  %s2168_s13 = smov %s1737_s14 }
 0x222   : > { %s2169_s14 = smov %s1934_s30  ;;  %s2170_s15 = smov %s1745_s16 }
 0x223   : > { %s2171_s16 = smov %s2173_s11  ;;  %19 = sbr.rel (!%p17_p2) target bundleno = 7 (0x7), region = 94 }
 0x22a   :  { %1277 = vsyncpa [#allocation3], 1 }
 0x22b   :  { %1279 = vsyncpa [#allocation3 + $0x1], 1 }
 0x22c   :  { %1280 = vsyncpa [#allocation6], 1 }
 0x22d   :  { %1281 = vsyncpa [#allocation4], 1 }
 0x22e   :  { %1283 = vsyncpa [#allocation4 + $0x1], 1 }

</bundles_post_ra>
